<compile_context>
chip_gen: v5e
topology: v5e:2x2
jax: 0.10.0
libtpu: 0.0.40
codegen_flags: <defaults>
</compile_context>

<pallas_src>
import jax
import jax.numpy as jnp
from jax.experimental import pallas as pl
from jax.experimental.pallas import tpu as pltpu


def _dice_partial_kernel(x_ref, t_ref, inter_ref, union_ref):
    # x_ref: (bn, tr, L)  -- channel 0 already selected + squeezed by BlockSpec
    # t_ref: (bn, tr, L)  -- stored dtype; cast on the VPU (hidden under DMA)
    x = x_ref[...].astype(jnp.float32)
    t = t_ref[...].astype(jnp.float32)

    prod = x * t          # contributes to intersection
    ssum = x + t          # contributes to union (= sum(x) + sum(t))

    bn, tr, L = prod.shape
    rows = bn * tr
    if rows % 8 == 0:
        # Free-view regroup to (rows//8, 8, L) (native f32 sublane tiling) and
        # reduce the leading axis with pure VPU adds -> (8, L) partial.
        ip = jnp.sum(prod.reshape(rows // 8, 8, L), axis=0)
        up = jnp.sum(ssum.reshape(rows // 8, 8, L), axis=0)
    else:
        # Small / ragged block: one cheap cross-sublane reduce -> (1, L).
        ip = jnp.sum(prod, axis=(0, 1)).reshape(1, L)
        up = jnp.sum(ssum, axis=(0, 1)).reshape(1, L)

    # Each grid step owns its own output block -> no accumulation, no pl.when,
    # and both grid axes can be sharded across TensorCores.
    inter_ref[0, 0] = ip
    union_ref[0, 0] = up


def soft_dice_loss(x, target, *, block_budget_bytes=4 * 1024 * 1024):
    """x: (N, C, H, W) float; target: (N, H, W), any dtype. Returns (1,) f32."""
    N, C, H, W = x.shape
    HW = H * W

    # Lane-dense internal pixel layout: (R, 128) when H*W is a multiple of 128
    # (trailing-dim reshapes are metadata-only, no HBM copy). Otherwise fall
    # back to the native (H, W) tiling (last-two dims == full array dims, so
    # the (8,128) BlockSpec constraint is always satisfied).
    if HW % 128 == 0:
        R, L = HW // 128, 128
    else:
        # TODO(synk): when H*W is not a multiple of 128 no zero-copy lane-dense
        # factorization exists; W << 128 leaves most lanes masked.
        R, L = H, W

    x_r = x.reshape(N, C, R, L)
    t_r = target.reshape(N, R, L)  # stored dtype; f32 cast happens in-kernel

    xb = x.dtype.itemsize
    tb = target.dtype.itemsize
    row_bytes = L * (xb + tb)      # one pixel-row of x + t (single copy)
    img_bytes = R * row_bytes      # one image's channel-0 plane + mask

    # --- choose the per-step tile: (bn images) x (tr pixel-rows) ------------
    if img_bytes <= block_budget_bytes:
        # Whole image(s) per step; batch images to amortize the ~0.35us/step
        # overhead. bn must divide N so no block ever carries out-of-range
        # batch garbage into the reduction.
        # TODO(synk): prime/odd N with tiny images collapses toward bn=1; an
        # in-kernel batch mask would lift the divisor restriction.
        tr = R
        bn = 1
        for d in range(1, N + 1):
            if N % d == 0 and d * img_bytes <= block_budget_bytes:
                bn = d
    else:
        # Large image: one image per step, tile the pixel-row axis instead so
        # the double-buffered working set stays small (critical on v7x 64 MiB)
        # and the row-tile grid axis gives megacore something to shard.
        bn = 1
        tr = R
        if L == 128:
            best = None
            for d in range(8, R + 1, 8):          # multiples of 8 dividing R
                if R % d == 0 and d * row_bytes <= block_budget_bytes:
                    best = d
            if best is not None:
                tr = best
        # TODO(synk): if R has no suitable multiple-of-8 divisor we fall back
        # to the whole image per step (rare: R prime / non-multiple-of-8).

    rows = bn * tr
    acc_r = 8 if rows % 8 == 0 else 1   # must match the kernel's static branch

    num_r = R // tr
    num_n = N // bn
    grid = (num_r, num_n)

    # Explicit VMEM budget: double-buffered x + target blocks, double-buffered
    # tiny partial outputs, plus headroom. Capped at 75% of the real per-core
    # VMEM so the request is valid on 64 MiB (v7x) and 128 MiB (v5e/v6e).
    block_in_bytes = bn * tr * L * (xb + tb)
    out_bytes = 2 * acc_r * L * 4
    need = 2 * block_in_bytes + 2 * out_bytes + (2 << 20)
    try:
        vmem_cap = int(pltpu.get_tpu_info().vmem_capacity_bytes)
    except Exception:
        vmem_cap = 64 * 1024 * 1024   # conservative: v7x per-TensorCore VMEM
    vmem_limit = int(min(max(need, 16 * 1024 * 1024), (vmem_cap * 3) // 4))

    inter_part, union_part = pl.pallas_call(
        _dice_partial_kernel,
        out_shape=(
            jax.ShapeDtypeStruct((num_r, num_n, acc_r, L), jnp.float32),
            jax.ShapeDtypeStruct((num_r, num_n, acc_r, L), jnp.float32),
        ),
        grid_spec=pltpu.PrefetchScalarGridSpec(
            num_scalar_prefetch=0,
            grid=grid,
            in_specs=[
                # Channel 0 selected + squeezed here: only channel-0 slabs of x
                # are DMA'd from HBM and the kernel ref is already (bn, tr, L).
                pl.BlockSpec((bn, pl.Squeezed(), tr, L),
                             lambda r, n: (n, 0, r, 0)),
                pl.BlockSpec((bn, tr, L), lambda r, n: (n, r, 0)),
            ],
            out_specs=[
                pl.BlockSpec((1, 1, acc_r, L), lambda r, n: (r, n, 0, 0)),
                pl.BlockSpec((1, 1, acc_r, L), lambda r, n: (r, n, 0, 0)),
            ],
        ),
        compiler_params=pltpu.CompilerParams(
            # Every step writes its own output block -> both axes are truly
            # parallel; on v7x the compiler shards them across both TCs.
            dimension_semantics=("parallel", "parallel"),
            vmem_limit_bytes=vmem_limit,
        ),
    )(x_r, t_r)

    # Tiny combine + divide in the wrapper (a few KiB of partials).
    intersection = jnp.sum(inter_part)
    unionset = jnp.sum(union_part)
    smooth = 0.0  # forward() overrides self.smooth with 0.0
    dice = (2.0 * intersection + smooth) / (unionset + smooth)
    return (1.0 - dice).reshape(1)


def _reference(x, target):
    x0 = x[:, 0].astype(jnp.float32)
    t = target.astype(jnp.float32)
    intersection = jnp.sum(x0 * t)
    unionset = jnp.sum(x0) + jnp.sum(t)
    dice = (2.0 * intersection) / unionset
    return (1.0 - dice).reshape(1)


if __name__ == "__main__":
    key = jax.random.PRNGKey(0)
    k1, k2, k3, k4 = jax.random.split(key, 4)

    # Test 1: small module-consistent shapes (exercises the ragged acc_r=1 path).
    N, C, H, W = 2, 4, 16, 16
    x = jax.random.uniform(k1, (N, C, H, W), dtype=jnp.float32)
    target = (jax.random.uniform(k2, (N, H, W)) > 0.5).astype(jnp.float32)

    loss = jax.block_until_ready(soft_dice_loss(x, target))
    ref = _reference(x, target)
    assert loss.shape == (1,)
    assert jnp.allclose(loss, ref, rtol=1e-5, atol=1e-6), (loss, ref)

    # Test 2: force the row-tiled, multi-step, (8,128)-partial path with a tiny
    # per-step budget (still small data; grid=(2,2), acc_r=8).
    N2, C2, H2, W2 = 2, 3, 64, 64
    x2 = jax.random.uniform(k3, (N2, C2, H2, W2), dtype=jnp.float32)
    target2 = (jax.random.uniform(k4, (N2, H2, W2)) > 0.5).astype(jnp.float32)

    loss2 = jax.block_until_ready(
        soft_dice_loss(x2, target2, block_budget_bytes=16 * 1024))
    ref2 = _reference(x2, target2)
    assert loss2.shape == (1,)
    assert jnp.allclose(loss2, ref2, rtol=1e-5, atol=1e-6), (loss2, ref2)

    print("KERNEL_OK")
</pallas_src>

<mosaic_0001>
module attributes {stable_mosaic.version = 11 : i64} {
  func.func @_dice_partial_kernel(%arg0: i32, %arg1: i32, %arg2: memref<2x1x2x128xf32, #tpu.memory_space<vmem>>, %arg3: memref<2x2x128xf32, #tpu.memory_space<vmem>>, %arg4: memref<1x1x1x128xf32, #tpu.memory_space<vmem>>, %arg5: memref<1x1x1x128xf32, #tpu.memory_space<vmem>>) attributes {dimension_semantics = [#tpu.dimension_semantics<parallel>, #tpu.dimension_semantics<parallel>], iteration_bounds = array<i64: 1, 1>, scalar_prefetch = 0 : i64, scratch_operands = 0 : i64, tpu.core_type = #tpu.core_type<tc>, window_params = [{transform_indices = @transform_0, window_bounds = array<i64: 2, 1, 2, 128>}, {transform_indices = @transform_1, window_bounds = array<i64: 2, 2, 128>}, {transform_indices = @transform_2, window_bounds = array<i64: 1, 1, 1, 128>}, {transform_indices = @transform_3, window_bounds = array<i64: 1, 1, 1, 128>}]} {
    %c0 = arith.constant 0 : index
    %c0_0 = arith.constant 0 : index
    %c0_1 = arith.constant 0 : index
    %c0_2 = arith.constant 0 : index
    %0 = vector.load %arg2[%c0, %c0_0, %c0_1, %c0_2] : memref<2x1x2x128xf32, #tpu.memory_space<vmem>>, vector<2x1x2x128xf32>
    %1 = vector.shape_cast %0 : vector<2x1x2x128xf32> to vector<2x2x128xf32>
    %c0_3 = arith.constant 0 : index
    %c0_4 = arith.constant 0 : index
    %c0_5 = arith.constant 0 : index
    %2 = vector.load %arg3[%c0_3, %c0_4, %c0_5] : memref<2x2x128xf32, #tpu.memory_space<vmem>>, vector<2x2x128xf32>
    %3 = arith.mulf %1, %2 : vector<2x2x128xf32>
    %4 = arith.addf %1, %2 : vector<2x2x128xf32>
    %cst = arith.constant dense<0.000000e+00> : vector<128xf32>
    %5 = vector.multi_reduction <add>, %3, %cst [0, 1] : vector<2x2x128xf32> to vector<128xf32>
    %6 = vector.shape_cast %5 : vector<128xf32> to vector<1x128xf32>
    %cst_6 = arith.constant dense<0.000000e+00> : vector<128xf32>
    %7 = vector.multi_reduction <add>, %4, %cst_6 [0, 1] : vector<2x2x128xf32> to vector<128xf32>
    %8 = vector.shape_cast %7 : vector<128xf32> to vector<1x128xf32>
    %c0_7 = arith.constant 0 : index
    %c0_8 = arith.constant 0 : index
    %c0_9 = arith.constant 0 : index
    %c0_10 = arith.constant 0 : index
    %9 = vector.load %arg4[%c0_7, %c0_8, %c0_9, %c0_10] : memref<1x1x1x128xf32, #tpu.memory_space<vmem>>, vector<1x1x1x128xf32>
    %10 = vector.shape_cast %9 : vector<1x1x1x128xf32> to vector<1x128xf32>
    %11 = vector.shape_cast %6 : vector<1x128xf32> to vector<1x1x1x128xf32>
    tpu.vector_store %arg4[%c0_7, %c0_8, %c0_9, %c0_10], %11 {strides = array<i32>} : memref<1x1x1x128xf32, #tpu.memory_space<vmem>>, vector<1x1x1x128xf32>,
    %c0_11 = arith.constant 0 : index
    %c0_12 = arith.constant 0 : index
    %c0_13 = arith.constant 0 : index
    %c0_14 = arith.constant 0 : index
    %12 = vector.load %arg5[%c0_11, %c0_12, %c0_13, %c0_14] : memref<1x1x1x128xf32, #tpu.memory_space<vmem>>, vector<1x1x1x128xf32>
    %13 = vector.shape_cast %12 : vector<1x1x1x128xf32> to vector<1x128xf32>
    %14 = vector.shape_cast %8 : vector<1x128xf32> to vector<1x1x1x128xf32>
    tpu.vector_store %arg5[%c0_11, %c0_12, %c0_13, %c0_14], %14 {strides = array<i32>} : memref<1x1x1x128xf32, #tpu.memory_space<vmem>>, vector<1x1x1x128xf32>,
    return
  }
  func.func @transform_0(%arg0: i32, %arg1: i32) -> (i32, i32, i32, i32) {
    %c0_i32 = arith.constant 0 : i32
    %c0_i32_0 = arith.constant 0 : i32
    %c0_i32_1 = arith.constant 0 : i32
    return %arg1, %c0_i32, %arg0, %c0_i32_0 : i32, i32, i32, i32
  }
  func.func @transform_1(%arg0: i32, %arg1: i32) -> (i32, i32, i32) {
    %c0_i32 = arith.constant 0 : i32
    %c0_i32_0 = arith.constant 0 : i32
    return %arg1, %arg0, %c0_i32 : i32, i32, i32
  }
  func.func @transform_2(%arg0: i32, %arg1: i32) -> (i32, i32, i32, i32) {
    %c0_i32 = arith.constant 0 : i32
    %c0_i32_0 = arith.constant 0 : i32
    %c0_i32_1 = arith.constant 0 : i32
    return %arg0, %arg1, %c0_i32, %c0_i32_0 : i32, i32, i32, i32
  }
  func.func @transform_3(%arg0: i32, %arg1: i32) -> (i32, i32, i32, i32) {
    %c0_i32 = arith.constant 0 : i32
    %c0_i32_0 = arith.constant 0 : i32
    %c0_i32_1 = arith.constant 0 : i32
    return %arg0, %arg1, %c0_i32, %c0_i32_0 : i32, i32, i32, i32
  }
}

</mosaic_0001>

<bundles_post_ra>
// kernel: tpu_custom_call.1
= control target key start
LH: loop header
LB: loop body
LE: loop exit
PB: predicated region body
PF: predicated region fallthrough
CT: control target
= control target key end

     0   :  { %9 = vsyncpa [#allocation3], 0  ;;  %s260_s0 = inlined_call_operand.hbm [shape: f32[2,4,2,128], index: 0, kind: input, shape index: {}]   ;;  %s261_s1 = inlined_call_operand.hbm [shape: f32[2,2,128], index: 1, kind: input, shape index: {}]   ;;  %s262_s2 = inlined_call_operand.hbm [shape: f32[1,1,1,128], index: 2, kind: output, shape index: {0}]   ;;  %s263_s3 = inlined_call_operand.hbm [shape: f32[1,1,1,128], index: 3, kind: output, shape index: {1}]  }
   0x1   :  { %10 = vsyncpa [#allocation6], 0 }
   0x2   :  { %11 = vsyncpa [#allocation4], 0 }
   0x3   :  { %12 = vsyncpa [#allocation9], 0  ;;  %s17_s14 = sshll.u32 %s260_s0, 4  ;;  %s221_s15 = smov [#allocation2]   ;;  %s18_s14 = int_to_ptr.hbm [resolvable:$true] %s17_s14 }
   0x4   :  { %s19_s16 = sshll.u32 %s221_s15, 4  ;;  %s222_s17 = smov 128   ;;  %s20_s16 = int_to_ptr.vmem [resolvable:$true] %s19_s16 }
   0x5   :  { %s223_s18 = smov 32   ;;  %s224_s19 = smov 2  }
   0x6   :  { %25 = dma.hbm_to_vmem [thread:$0]  %s18_s14, 64, %s20_s16, [#allocation3], %s222_s17, %s223_s18, %s224_s19  }
   0x7   :  { %s30_s22 = sshll.u32 %s261_s1, 4  ;;  %s225_s23 = smov [#allocation5]   ;;  %s31_s22 = int_to_ptr.hbm [resolvable:$true] %s30_s22 }
   0x8   :  { %s32_s24 = sshll.u32 %s225_s23, 4  ;;  %s33_s24 = int_to_ptr.vmem [resolvable:$true] %s32_s24 }
   0x9   :  { %38 = dma.hbm_to_vmem [thread:$0]  %s31_s22, 64, %s33_s24, [#allocation6], %s223_s18, %s223_s18, %s224_s19  }
   0xa   :  { %213 = dma.done.wait [#allocation3], 64  }
   0xb   :  { %214 = vsyncadd [#allocation3], 4294967232 }
   0xc   :  { %215 = dma.done.wait [#allocation6], 64  }
   0xd   :  { %216 = vsyncadd [#allocation6], 4294967232  ;;  %vm55_vm0 = vcmask 1041408   ;;  %v47_v0 = vld [vmem:[#allocation2] sm:$0x3]  ;;  %s226_s0 = smov [#allocation7]  }
   0xe   :  { %v48_v1 = vld [vmem:[#allocation2 + $0x2] sm:$0x3]  ;;  %v49_v2 = vld [vmem:[#allocation5] sm:$0x3]  ;;  %v50_v3 = vld [vmem:[#allocation5 + $0x2] sm:$0x3] }
   0xf   :  { %v51_v4 = vmul.f32 %v49_v2, %v47_v0  ;;  %v53_v5 = vadd.f32 %v49_v2, %v47_v0  ;;  %v52_v6 = vmul.f32 %v50_v3, %v48_v1  ;;  %v54_v7 = vadd.f32 %v50_v3, %v48_v1  ;;  %s81_s1 = sshll.u32 %s226_s0, 4  ;;  %s83_s27 = sshll.u32 %s262_s2, 4  ;;  %s82_s1 = int_to_ptr.vmem [resolvable:$true] %s81_s1  ;;  %s84_s27 = int_to_ptr.hbm [resolvable:$true] %s83_s27 }
  0x10   :  { %s227_s28 = smov [#allocation8]   ;;  %s94_s5 = sshll.u32 %s263_s3, 4  ;;  %s95_s5 = int_to_ptr.hbm [resolvable:$true] %s94_s5 }
  0x11   :  { %v56_v8 = vsel %vm55_vm0, %v51_v4, 0.0  ;;  %v65_v9 = vsel %vm55_vm0, %v53_v5, 0.0  ;;  %v57_v10 = vsel %vm55_vm0, %v52_v6, 0.0  ;;  %v66_v11 = vsel %vm55_vm0, %v54_v7, 0.0  ;;  %s92_s29 = sshll.u32 %s227_s28, 4  ;;  %s93_s29 = int_to_ptr.vmem [resolvable:$true] %s92_s29 }
  0x12   :  { %v58_v12 = vadd.f32 %v57_v10, %v56_v8  ;;  %v67_v13 = vadd.f32 %v66_v11, %v65_v9 }
  0x14   :  { %v59_v14 = vrot.slane %v58_v12, 4  ;;  %v68_v15 = vrot.slane %v67_v13, 4 }
  0x16   :  { %v60_v16 = vadd.f32 %v59_v14, %v58_v12  ;;  %v69_v17 = vadd.f32 %v68_v15, %v67_v13 }
  0x18   :  { %v61_v18 = vrot.slane %v60_v16, 2  ;;  %v70_v19 = vrot.slane %v69_v17, 2 }
  0x1a   :  { %v62_v20 = vadd.f32 %v61_v18, %v60_v16  ;;  %v71_v21 = vadd.f32 %v70_v19, %v69_v17 }
  0x1c   :  { %v63_v22 = vrot.slane %v62_v20, 1  ;;  %v72_v23 = vrot.slane %v71_v21, 1 }
  0x1e   :  { %v64_v24 = vadd.f32 %v63_v22, %v62_v20  ;;  %v73_v25 = vadd.f32 %v72_v23, %v71_v21 }
  0x20   :  { %74 = vst [vmem:[#allocation7] sm:$0x1] %v64_v24 }
  0x21   :  { %75 = vst [vmem:[#allocation8] sm:$0x1] %v73_v25  ;;  %86 = dma.vmem_to_hbm [thread:$0]  %s82_s1, 16, %s84_s27, [#allocation4]  }
  0x22   :  { %97 = dma.vmem_to_hbm [thread:$0]  %s93_s29, 16, %s95_s5, [#allocation9]  }
  0x23   :  { %217 = dma.done.wait [#allocation4], 16  }
  0x24   :  { %218 = vsyncadd [#allocation4], 4294967280 }
  0x25   :  { %219 = dma.done.wait [#allocation9], 16  }
  0x26   :  { %220 = vsyncadd [#allocation9], 4294967280 }
  0x27   :  { %106 = vsyncpa [#allocation3], 1 }
  0x28   :  { %107 = vsyncpa [#allocation6], 1 }
  0x29   :  { %108 = vsyncpa [#allocation4], 1 }
  0x2a   :  { %109 = vsyncpa [#allocation9], 1 }

</bundles_post_ra>
